<compile_context>
chip_gen: v5e
topology: v5e:2x2
jax: 0.10.0
libtpu: 0.0.40
codegen_flags: <defaults>
</compile_context>

<pallas_src>
import math
import jax
import jax.numpy as jnp
from jax import lax
from jax.experimental import pallas as pl
from jax.experimental.pallas import tpu as pltpu

NEG_INF = -1e30


# ----------------------------- helpers --------------------------------------

def _pick_tile(dim, target, align):
    """Largest tile <= target that divides dim and is `align`-aligned, else full dim.
    NOTE: the full-dim fallback can exceed VMEM for pathological (prime) dims; callers
    use shapes that are powers of two / multiples of 128 in practice."""
    if dim <= target:
        return dim
    t = (target // align) * align
    while t >= align:
        if dim % t == 0:
            return t
        t -= align
    return dim


def _vmem_limit_bytes():
    # Derive per-chip (v7x has only 64 MiB physical VMEM); cap at 32 MiB.
    try:
        cap = pltpu.get_tpu_info().vmem_capacity_bytes
        return min(32 * 1024 * 1024, cap // 2)
    except Exception:
        return 32 * 1024 * 1024


# ----------------------------- Pallas kernels --------------------------------

def rms_inv(x, eps=1e-6, tm=256):
    """Per-row 1/rms(x) -> (M, 1) f32.  Only used once per encoder call (for the first
    layer norm of the stack); all subsequent inv-rms values are produced as fused side
    outputs of the preceding lora_matmul."""
    M, H = x.shape
    tm = _pick_tile(M, tm, 16)

    def kernel(x_ref, o_ref):
        xv = x_ref[...].astype(jnp.float32)
        var = jnp.mean(xv * xv, axis=-1, keepdims=True)
        o_ref[...] = lax.rsqrt(var + eps)

    return pl.pallas_call(
        kernel,
        out_shape=jax.ShapeDtypeStruct((M, 1), jnp.float32),
        grid=(M // tm,),
        in_specs=[pl.BlockSpec((tm, H), lambda i: (i, 0))],
        out_specs=pl.BlockSpec((tm, 1), lambda i: (i, 0)),
        compiler_params=pltpu.CompilerParams(dimension_semantics=("parallel",)),
    )(x)


def lora_matmul(x, w, a, b, *, ln_w=None, inv_rms=None, residual=None,
                swiglu_pair=False, emit_inv_rms=False, rms_eps=1e-6,
                out_dtype=jnp.bfloat16, tm=512, tn=512, tk=512):
    """Fused LoRA projection:
         out = f(x) @ W + (f(x) @ A) @ B  [+ residual]
       where f(x) = x * inv_rms * ln_w          (fused RMSNorm)   if ln_w is given
             f(x) = silu(x[:, :K]) * x[:, K:]   (fused SwiGLU)    if swiglu_pair
             f(x) = x                                             otherwise
       * W/A/B are bf16, activations bf16 at the MXU inputs, f32 VMEM accumulation.
       * x@A is computed only for the first N tile (pl.when(j==0)) and reused across j
         (grid j axis marked "arbitrary" so the scratch carry is legal on megacore).
       * If emit_inv_rms, also returns a (M, 1) f32 per-row 1/rms of the final output
         (post-residual) accumulated across the j axis - feeds the next RMSNorm for free.
       alpha/r is pre-folded into B.
    """
    M = x.shape[0]
    K, N = w.shape
    R = a.shape[1]

    tm = _pick_tile(M, tm, 16)
    tn = _pick_tile(N, tn, 128)
    tk = _pick_tile(K, tk, 128)
    n_kb = K // tk

    do_norm = ln_w is not None
    has_res = residual is not None
    assert not (do_norm and swiglu_pair)
    if swiglu_pair:
        assert x.shape[1] == 2 * K
    else:
        assert x.shape[1] == K

    inputs, in_specs = [], []
    if swiglu_pair:
        inputs += [x, x]  # gate half / up half streamed per K-tile
        in_specs += [pl.BlockSpec((tm, tk), lambda i, j, k: (i, k)),
                     pl.BlockSpec((tm, tk), lambda i, j, k: (i, k + n_kb))]
    else:
        inputs += [x]
        in_specs += [pl.BlockSpec((tm, tk), lambda i, j, k: (i, k))]
    if do_norm:
        inputs += [inv_rms, ln_w.reshape(1, K).astype(jnp.float32)]
        in_specs += [pl.BlockSpec((tm, 1), lambda i, j, k: (i, 0)),
                     pl.BlockSpec((1, tk), lambda i, j, k: (0, k))]
    inputs += [w, a, b]
    in_specs += [pl.BlockSpec((tk, tn), lambda i, j, k: (k, j)),
                 pl.BlockSpec((tk, R), lambda i, j, k: (k, 0)),
                 pl.BlockSpec((R, tn), lambda i, j, k: (0, j))]
    if has_res:
        inputs += [residual]
        in_specs += [pl.BlockSpec((tm, tn), lambda i, j, k: (i, j))]

    n_out = 2 if emit_inv_rms else 1
    n_scr = 3 if emit_inv_rms else 2

    def kernel(*refs):
        scratch = refs[len(refs) - n_scr:]
        acc_ref, acca_ref = scratch[0], scratch[1]
        ssq_ref = scratch[2] if emit_inv_rms else None
        outs = refs[len(refs) - n_scr - n_out: len(refs) - n_scr]
        o_ref = outs[0]
        rinv_ref = outs[1] if emit_inv_rms else None
        it = iter(refs[: len(refs) - n_scr - n_out])
        if swiglu_pair:
            g_ref = next(it)
            u_ref = next(it)
        else:
            x_ref = next(it)
        if do_norm:
            inv_in_ref = next(it)
            lnw_ref = next(it)
        w_ref = next(it)
        a_ref = next(it)
        b_ref = next(it)
        res_ref = next(it) if has_res else None

        j = pl.program_id(1)
        kb = pl.program_id(2)
        nj = pl.num_programs(1)
        nk = pl.num_programs(2)

        @pl.when(kb == 0)
        def _():
            acc_ref[...] = jnp.zeros_like(acc_ref)

        @pl.when((j == 0) & (kb == 0))
        def _():
            acca_ref[...] = jnp.zeros_like(acca_ref)
            if emit_inv_rms:
                ssq_ref[...] = jnp.zeros_like(ssq_ref)

        if swiglu_pair:
            g = g_ref[...].astype(jnp.float32)
            u = u_ref[...].astype(jnp.float32)
            xv = jax.nn.silu(g) * u
        else:
            xv = x_ref[...].astype(jnp.float32)
            if do_norm:
                xv = xv * inv_in_ref[...] * lnw_ref[...]
        xb = xv.astype(jnp.bfloat16)

        # base-weight matmul (every j, every k)
        acc_ref[...] += jnp.dot(xb, w_ref[...], preferred_element_type=jnp.float32)

        # LoRA x@A: hoisted -> only computed for the first N tile, reused across j.
        @pl.when(j == 0)
        def _():
            acca_ref[...] += jnp.dot(xb, a_ref[...], preferred_element_type=jnp.float32)

        @pl.when(kb == nk - 1)
        def _():
            # NOTE: acca is downcast to bf16 for the tiny (tm,R)@(R,tn) MXU pass;
            # standard practice for LoRA, accepted precision trade-off.
            out = acc_ref[...] + jnp.dot(acca_ref[...].astype(jnp.bfloat16),
                                         b_ref[...],
                                         preferred_element_type=jnp.float32)
            if has_res:
                out = out + res_ref[...].astype(jnp.float32)
            o_ref[...] = out.astype(o_ref.dtype)
            if emit_inv_rms:
                ssq_ref[...] += jnp.sum(out * out, axis=-1, keepdims=True)

        if emit_inv_rms:
            @pl.when((kb == nk - 1) & (j == nj - 1))
            def _():
                rinv_ref[...] = lax.rsqrt(ssq_ref[...] * (1.0 / float(N)) + rms_eps)

    if emit_inv_rms:
        out_shape = (jax.ShapeDtypeStruct((M, N), out_dtype),
                     jax.ShapeDtypeStruct((M, 1), jnp.float32))
        out_specs = (pl.BlockSpec((tm, tn), lambda i, j, k: (i, j)),
                     pl.BlockSpec((tm, 1), lambda i, j, k: (i, 0)))
    else:
        out_shape = jax.ShapeDtypeStruct((M, N), out_dtype)
        out_specs = pl.BlockSpec((tm, tn), lambda i, j, k: (i, j))

    scratch = [pltpu.VMEM((tm, tn), jnp.float32),
               pltpu.VMEM((tm, R), jnp.float32)]
    if emit_inv_rms:
        scratch.append(pltpu.VMEM((tm, 1), jnp.float32))

    return pl.pallas_call(
        kernel,
        out_shape=out_shape,
        grid=(M // tm, N // tn, n_kb),
        in_specs=in_specs,
        out_specs=out_specs,
        scratch_shapes=scratch,
        compiler_params=pltpu.CompilerParams(
            # j carries the hoisted x@A / ssq scratch across N tiles -> arbitrary;
            # megacore parallelism rides the (largest) i axis.
            dimension_semantics=("parallel", "arbitrary", "arbitrary"),
            vmem_limit_bytes=_vmem_limit_bytes()),
    )(*inputs)


def flash_attention(q, k, v, mask3, cos, sin, nH, Dh, tq=256, tkv=512):
    """Causal + padding-mask attention with fused RoPE.
    q, k, v : [N, S, H] bf16 (H = nH*Dh, lane-dense); mask3: [N, 1, S] (1.0 = real token).
    cos/sin : [S, Dh] f32, sin is sign-folded ([-sin | +sin]) for roll-based rotate_half.
    Grid = (batch, head-group, q-tile, kv-block); online softmax over the KV axis,
    fully-causally-masked (q-tile, kv-block) pairs skip all compute.
    Note: padded query rows produce finite garbage; they are never consumed because only
    the last real token is pooled downstream.
    """
    N_, S, H = q.shape
    assert H == nH * Dh
    # head grouping: smallest lane-aligned group (Dh itself when Dh % 128 == 0)
    Gw = Dh
    while Gw < H and Gw % 128 != 0:
        Gw += Dh
    if H % Gw != 0:
        Gw = H
    n_hg = H // Gw
    hpg = Gw // Dh
    half = Dh // 2

    tq = _pick_tile(S, tq, 16)
    tkv = _pick_tile(S, tkv, 128)
    n_q = S // tq
    n_kv = S // tkv
    scale = 1.0 / math.sqrt(Dh)

    def rotate_half(xv):
        if Dh % 128 == 0:
            return pltpu.roll(xv, half, axis=1)          # XLU rotate, lane-aligned heads
        return jnp.concatenate([xv[:, half:], xv[:, :half]], axis=1)

    def kernel(q_ref, k_ref, v_ref, m_ref, cq_ref, sq_ref, ck_ref, sk_ref,
               o_ref, acc_ref, m_scr, l_scr):
        qi = pl.program_id(2)
        ki = pl.program_id(3)
        q_start = qi * tq
        kv_start = ki * tkv

        @pl.when(ki == 0)
        def _():
            acc_ref[...] = jnp.zeros_like(acc_ref)
            m_scr[...] = jnp.full_like(m_scr, -jnp.inf)
            l_scr[...] = jnp.zeros_like(l_scr)

        # causal block skip: kv block entirely above the diagonal of this q tile
        @pl.when(kv_start <= q_start + (tq - 1))
        def _():
            kv_ok = m_ref[0] > 0.5                                     # (1, tkv)
            rows = q_start + lax.broadcasted_iota(jnp.int32, (tq, tkv), 0)
            cols = kv_start + lax.broadcasted_iota(jnp.int32, (tq, tkv), 1)
            allowed = (cols <= rows) & kv_ok                           # (tq, tkv)
            cq = cq_ref[...]
            sq = sq_ref[...]
            ck = ck_ref[...]
            sk = sk_ref[...]
            for hh in range(hpg):
                lo, hi = hh * Dh, (hh + 1) * Dh
                qh = q_ref[0, :, lo:hi].astype(jnp.float32)            # (tq, Dh)
                kh = k_ref[0, :, lo:hi].astype(jnp.float32)            # (tkv, Dh)
                # fused RoPE (sin sign-folded, so x*cos + rot(x)*sin == rope(x))
                qh = qh * cq + rotate_half(qh) * sq
                kh = kh * ck + rotate_half(kh) * sk
                vh = v_ref[0, :, lo:hi].astype(jnp.bfloat16)           # (tkv, Dh)
                s = lax.dot_general(qh.astype(jnp.bfloat16), kh.astype(jnp.bfloat16),
                                    (((1,), (1,)), ((), ())),
                                    preferred_element_type=jnp.float32) * scale
                s = jnp.where(allowed, s, NEG_INF)
                m_prev = m_scr[hh]                                     # (tq, 1)
                m_new = jnp.maximum(m_prev, jnp.max(s, axis=-1, keepdims=True))
                alpha = jnp.exp(m_prev - m_new)
                p = jnp.exp(s - m_new)
                l_scr[hh] = alpha * l_scr[hh] + jnp.sum(p, axis=-1, keepdims=True)
                acc_ref[:, lo:hi] = alpha * acc_ref[:, lo:hi] + jnp.dot(
                    p.astype(jnp.bfloat16), vh, preferred_element_type=jnp.float32)
                m_scr[hh] = m_new

        @pl.when(ki == pl.num_programs(3) - 1)
        def _():
            for hh in range(hpg):
                lo, hi = hh * Dh, (hh + 1) * Dh
                # exact divide: runs once per q tile, avoids approx-reciprocal error
                acc_ref[:, lo:hi] = acc_ref[:, lo:hi] / l_scr[hh]
            o_ref[0] = acc_ref[...].astype(o_ref.dtype)

    return pl.pallas_call(
        kernel,
        out_shape=jax.ShapeDtypeStruct((N_, S, H), q.dtype),
        grid=(N_, n_hg, n_q, n_kv),
        in_specs=[pl.BlockSpec((1, tq, Gw), lambda b, hg, qi, ki: (b, qi, hg)),
                  pl.BlockSpec((1, tkv, Gw), lambda b, hg, qi, ki: (b, ki, hg)),
                  pl.BlockSpec((1, tkv, Gw), lambda b, hg, qi, ki: (b, ki, hg)),
                  pl.BlockSpec((1, 1, tkv), lambda b, hg, qi, ki: (b, 0, ki)),
                  pl.BlockSpec((tq, Dh), lambda b, hg, qi, ki: (qi, 0)),
                  pl.BlockSpec((tq, Dh), lambda b, hg, qi, ki: (qi, 0)),
                  pl.BlockSpec((tkv, Dh), lambda b, hg, qi, ki: (ki, 0)),
                  pl.BlockSpec((tkv, Dh), lambda b, hg, qi, ki: (ki, 0))],
        out_specs=pl.BlockSpec((1, tq, Gw), lambda b, hg, qi, ki: (b, qi, hg)),
        scratch_shapes=[pltpu.VMEM((tq, Gw), jnp.float32),
                        pltpu.VMEM((hpg, tq, 1), jnp.float32),
                        pltpu.VMEM((hpg, tq, 1), jnp.float32)],
        compiler_params=pltpu.CompilerParams(
            dimension_semantics=("parallel", "parallel", "parallel", "arbitrary")),
    )(q, k, v, mask3, cos, sin, cos, sin)


def last_token_pool(hidden_flat, lens, final_ln_w, S, rms_eps=1e-6, l2_eps=1e-12):
    """Gather hidden_flat[i*S + lens[i]-1, :] per sequence, apply the final RMSNorm
    (fused here since only gathered rows are consumed) and L2-normalize.
    Only a 16-row window (bf16 sublane tile) around the needed row is DMA'd; lens are
    clamped to >= 1 both in the index_map and the kernel."""
    M, H = hidden_flat.shape
    N_ = M // S
    W = 16
    g_ln = final_ln_w.reshape(1, H).astype(jnp.float32)

    def kernel(lens_ref, x_ref, g_ref, o_ref):
        i = pl.program_id(0)
        ln = jnp.maximum(lens_ref[i], 1)
        gidx = i * S + ln - 1
        r = gidx % W                                                   # row within window
        row = x_ref[pl.ds(r, 1), :].astype(jnp.float32)                # (1, H)
        var = jnp.mean(row * row, axis=-1, keepdims=True)
        y = row * lax.rsqrt(var + rms_eps) * g_ref[...]                # final RMSNorm
        ss = jnp.sum(y * y, axis=-1, keepdims=True)
        y = y * lax.rsqrt(jnp.maximum(ss, l2_eps * l2_eps))            # x / max(||x||, eps)
        o_ref[...] = y.reshape(1, 1, H).astype(o_ref.dtype)

    out = pl.pallas_call(
        kernel,
        out_shape=jax.ShapeDtypeStruct((N_, 1, H), jnp.float32),
        grid_spec=pltpu.PrefetchScalarGridSpec(
            num_scalar_prefetch=1,
            grid=(N_,),
            in_specs=[pl.BlockSpec(
                          (W, H),
                          lambda i, lens: ((i * S + jnp.maximum(lens[i], 1) - 1) // W, 0)),
                      pl.BlockSpec((1, H), lambda i, lens: (0, 0))],
            out_specs=pl.BlockSpec((1, 1, H), lambda i, lens: (i, 0, 0)),
        ),
        compiler_params=pltpu.CompilerParams(dimension_semantics=("arbitrary",)),
    )(lens.astype(jnp.int32), hidden_flat, g_ln)
    return out.reshape(N_, H)


# ------------------------------- JAX glue ------------------------------------

def rope_tables(S, Dh):
    half = Dh // 2
    pos = jnp.arange(S, dtype=jnp.float32)
    inv_freq = 1.0 / (10000.0 ** (jnp.arange(half, dtype=jnp.float32) / half))
    ang = pos[:, None] * inv_freq[None, :]                             # (S, half)
    cos = jnp.concatenate([jnp.cos(ang), jnp.cos(ang)], axis=-1)       # (S, Dh)
    # sign folded into sin so that rope(x) = x*cos + rotate_half_roll(x)*sin
    sin = jnp.concatenate([-jnp.sin(ang), jnp.sin(ang)], axis=-1)
    return cos, sin


def encoder_forward(params, input_ids, attention_mask, cfg):
    """Synthetic LLaMA-style encoder with QLoRA-adapted linears (bf16 residual stream).
    Returns the pre-final-norm hidden state flattened to [N*S, H]; the final RMSNorm is
    fused into last_token_pool (identical result for the pooled rows)."""
    N_, S = input_ids.shape
    H, nH, Dh = cfg["H"], cfg["nH"], cfg["Dh"]
    M = N_ * S
    x = jnp.take(params["embed"], input_ids, axis=0).reshape(M, H)     # (M, H) bf16
    mask3 = attention_mask.reshape(N_, 1, S).astype(jnp.float32)
    cos, sin = rope_tables(S, Dh)

    inv_rms = rms_inv(x)                       # only standalone norm pass per encoder call
    n_layers = len(params["layers"])
    for li, layer in enumerate(params["layers"]):
        # --- attention block: fused RMSNorm + fused QKV LoRA projection + fused RoPE ---
        qkv = lora_matmul(x, *layer["qkv"], ln_w=layer["ln1"], inv_rms=inv_rms)  # (M,3H) bf16
        qkv = qkv.reshape(N_, S, 3 * H)
        q, k, v = qkv[:, :, :H], qkv[:, :, H:2 * H], qkv[:, :, 2 * H:]
        attn = flash_attention(q, k, v, mask3, cos, sin, nH, Dh)       # (N,S,H) bf16
        # residual add fused into the wo matmul; inv-rms for ln2 emitted as side output
        x, inv_rms = lora_matmul(attn.reshape(M, H), *layer["o"],
                                 residual=x, emit_inv_rms=True)
        # --- MLP block: fused RMSNorm + gate/up LoRA, fused SwiGLU + down + residual ---
        gu = lora_matmul(x, *layer["gu"], ln_w=layer["ln2"], inv_rms=inv_rms)    # (M,2F)
        if li == n_layers - 1:
            x = lora_matmul(gu, *layer["d"], residual=x, swiglu_pair=True)
        else:
            x, inv_rms = lora_matmul(gu, *layer["d"], residual=x,
                                     swiglu_pair=True, emit_inv_rms=True)
    return x


def qlora_llama_forward(params, input_ids, attention_mask, n_negatives, cfg):
    """Mirrors QLoRALLaMa.forward with shared_weights=True (last-token pooling + L2 norm)."""
    S = input_ids.shape[1]
    g = n_negatives + 2
    am = attention_mask.reshape(-1, g, S)
    ids = input_ids.reshape(-1, g, S)
    docs_att = am[:, 1:, :].reshape(-1, S)
    queries_att = am[:, :1, :].reshape(-1, S)
    docs_ids = ids[:, 1:, :].reshape(-1, S)
    queries_ids = ids[:, :1, :].reshape(-1, S)

    q_hidden = encoder_forward(params, queries_ids, queries_att, cfg)
    q_lens = queries_att.sum(axis=1).astype(jnp.int32)
    q_reps = last_token_pool(q_hidden, q_lens, params["final_ln"], S)

    d_hidden = encoder_forward(params, docs_ids, docs_att, cfg)
    d_lens = docs_att.sum(axis=1).astype(jnp.int32)
    d_reps = last_token_pool(d_hidden, d_lens, params["final_ln"], S)

    bs = am.shape[0]
    dim = d_reps.shape[-1]
    return q_reps.reshape(bs, -1, dim), d_reps.reshape(bs, -1, dim)


# --------------------------- parameter init ----------------------------------

def init_params(key, cfg):
    H, F, r, vocab, n_layers, alpha = (cfg["H"], cfg["F"], cfg["r"],
                                       cfg["vocab"], cfg["n_layers"], cfg["alpha"])
    lora_scale = alpha / r
    keys = iter(jax.random.split(key, 4 + n_layers * 24))

    def nrm(shape, s=0.02):
        return (s * jax.random.normal(next(keys), shape)).astype(jnp.float32)

    def lora(din, dout):
        # Frozen base weight (stand-in for the NF4-dequantized weight) + LoRA A/B, bf16.
        w = nrm((din, dout)).astype(jnp.bfloat16)
        a = nrm((din, r), s=0.05).astype(jnp.bfloat16)
        b = (nrm((r, dout), s=0.05) * lora_scale).astype(jnp.bfloat16)  # alpha/r folded in
        return w, a, b

    def fuse(parts):
        # Concatenate base weights along N, LoRA-A along r, build block-diagonal B,
        # so one MXU pass produces all fused outputs.
        w_f = jnp.concatenate([p[0] for p in parts], axis=1)
        a_f = jnp.concatenate([p[1] for p in parts], axis=1)
        r_tot = sum(p[2].shape[0] for p in parts)
        n_tot = sum(p[2].shape[1] for p in parts)
        b_f = jnp.zeros((r_tot, n_tot), jnp.bfloat16)
        ro = no = 0
        for (_, _, bb) in parts:
            b_f = b_f.at[ro:ro + bb.shape[0], no:no + bb.shape[1]].set(bb)
            ro += bb.shape[0]
            no += bb.shape[1]
        return w_f, a_f, b_f

    layers = []
    for _ in range(n_layers):
        wq, wk, wv = lora(H, H), lora(H, H), lora(H, H)
        wo = lora(H, H)
        wg, wu = lora(H, F), lora(H, F)
        wd = lora(F, H)
        layers.append(dict(
            ln1=jnp.ones((H,), jnp.float32),
            ln2=jnp.ones((H,), jnp.float32),
            qkv=fuse([wq, wk, wv]),
            o=wo,
            gu=fuse([wg, wu]),
            d=wd,
        ))
    return dict(embed=nrm((vocab, H)).astype(jnp.bfloat16),
                final_ln=jnp.ones((H,), jnp.float32),
                layers=layers)


# --------------------------------- main ---------------------------------------

if __name__ == "__main__":
    cfg = dict(vocab=128, H=64, nH=4, Dh=16, F=128, n_layers=2, r=8, alpha=16)
    n_negatives = 1
    bs = 2
    S = 16
    group = n_negatives + 2           # query + positive + negatives
    N_total = bs * group              # flat batch of sequences, as the tokenizer would emit

    key = jax.random.PRNGKey(0)
    k_param, k_ids = jax.random.split(key)
    params = init_params(k_param, cfg)

    input_ids = jax.random.randint(k_ids, (N_total, S), 0, cfg["vocab"], dtype=jnp.int32)
    seq_lens = jnp.array([16, 12, 9, 16, 7, 11], dtype=jnp.int32)
    attention_mask = (jnp.arange(S)[None, :] < seq_lens[:, None]).astype(jnp.int32)

    q_reps, d_reps = qlora_llama_forward(params, input_ids, attention_mask,
                                         n_negatives, cfg)
    jax.block_until_ready((q_reps, d_reps))

    assert q_reps.shape == (bs, 1, cfg["H"])
    assert d_reps.shape == (bs, n_negatives + 1, cfg["H"])
    assert bool(jnp.all(jnp.isfinite(q_reps))) and bool(jnp.all(jnp.isfinite(d_reps)))
    print("KERNEL_OK")
</pallas_src>

<mosaic_0001>
module attributes {stable_mosaic.version = 11 : i64} {
  func.func @kernel(%arg0: i32, %arg1: memref<32x64xbf16, #tpu.memory_space<vmem>>, %arg2: memref<32x1xf32, #tpu.memory_space<vmem>>) attributes {dimension_semantics = [#tpu.dimension_semantics<parallel>], iteration_bounds = array<i64: 1>, scalar_prefetch = 0 : i64, scratch_operands = 0 : i64, tpu.core_type = #tpu.core_type<tc>, window_params = [{transform_indices = @transform_0, window_bounds = array<i64: 32, 64>}, {transform_indices = @transform_1, window_bounds = array<i64: 32, 1>}]} {
    %c0 = arith.constant 0 : index
    %c0_0 = arith.constant 0 : index
    %0 = vector.load %arg1[%c0, %c0_0] : memref<32x64xbf16, #tpu.memory_space<vmem>>, vector<32x64xbf16>
    %1 = arith.extf %0 : vector<32x64xbf16> to vector<32x64xf32>
    %2 = arith.mulf %1, %1 : vector<32x64xf32>
    %cst = arith.constant dense<0.000000e+00> : vector<32xf32>
    %3 = vector.multi_reduction <add>, %2, %cst [1] : vector<32x64xf32> to vector<32xf32>
    %4 = vector.shape_cast %3 : vector<32xf32> to vector<32x1xf32>
    %cst_1 = arith.constant 6.400000e+01 : f32
    %5 = vector.broadcast %cst_1 : f32 to vector<32x1xf32>
    %6 = arith.divf %4, %5 : vector<32x1xf32>
    %cst_2 = arith.constant 9.99999997E-7 : f32
    %7 = vector.broadcast %cst_2 : f32 to vector<32x1xf32>
    %8 = arith.addf %6, %7 : vector<32x1xf32>
    %9 = math.rsqrt %8 : vector<32x1xf32>
    %c0_3 = arith.constant 0 : index
    %c0_4 = arith.constant 0 : index
    %10 = vector.load %arg2[%c0_3, %c0_4] : memref<32x1xf32, #tpu.memory_space<vmem>>, vector<32x1xf32>
    tpu.vector_store %arg2[%c0_3, %c0_4], %9 {strides = array<i32>} : memref<32x1xf32, #tpu.memory_space<vmem>>, vector<32x1xf32>,
    return
  }
  func.func @transform_0(%arg0: i32) -> (i32, i32) {
    %c0_i32 = arith.constant 0 : i32
    %c0_i32_0 = arith.constant 0 : i32
    return %arg0, %c0_i32 : i32, i32
  }
  func.func @transform_1(%arg0: i32) -> (i32, i32) {
    %c0_i32 = arith.constant 0 : i32
    %c0_i32_0 = arith.constant 0 : i32
    return %arg0, %c0_i32 : i32, i32
  }
}

</mosaic_0001>

<bundles_post_ra>
// kernel: tpu_custom_call.1
= control target key start
LH: loop header
LB: loop body
LE: loop exit
PB: predicated region body
PF: predicated region fallthrough
CT: control target
= control target key end

     0   :  { %6 = vsyncpa [#allocation3], 0  ;;  %s163_s9 = smov [#allocation2]   ;;  %s164_s11 = smov 64   ;;  %s196_s0 = inlined_call_operand.hbm [shape: bf16[32,64], index: 0, kind: input, shape index: {}]   ;;  %s197_s1 = inlined_call_operand.vmem [shape: f32[32,1], index: 1, kind: output, shape index: {}]  }
   0x1   :  { %s11_s8 = sshll.u32 %s196_s0, 4  ;;  %s13_s10 = sshll.u32 %s163_s9, 4  ;;  %s12_s8 = int_to_ptr.hbm [resolvable:$true] %s11_s8  ;;  %s14_s10 = int_to_ptr.vmem [resolvable:$true] %s13_s10 }
   0x2   :  { %s165_s12 = smov 4  }
   0x3   :  { %19 = dma.hbm_to_vmem [thread:$0]  %s12_s8, 256, %s14_s10, [#allocation3], %s164_s11, %s164_s11, %s165_s12  }
   0x4   :  { %161 = dma.done.wait [#allocation3], 256  }
   0x5   :  { %162 = vsyncadd [#allocation3], 4294967040  ;;  %v122_v0 = vld [vmem:[#allocation2 + $0x8] sm:$0xff]   ;;  %v115_v1 = vld [vmem:[#allocation2] sm:$0xff]   ;;  %vm36_vm0 = vcmask 523264   ;;  %v166_v14 = vmov 64.0  }
   0x6   :  { %v120_v2 = vunpack.c.l.bf16 %v122_v0  ;;  %v116_v3 = vunpack.c.l.bf16 %v115_v1  ;;  %v121_v6 = vunpack.c.h.bf16 %v122_v0  ;;  %v117_v7 = vunpack.c.h.bf16 %v115_v1 }
   0x7   :  { %127 = vrcp.f32 %v166_v14  ;;  %vm104_vm4 = vcmask 7168  }
   0x8   :  { %v34_v4 = vmul.f32 %v120_v2, %v120_v2  ;;  %v32_v5 = vmul.f32 %v116_v3, %v116_v3  ;;  %v35_v10 = vmul.f32 %v121_v6, %v121_v6  ;;  %v33_v11 = vmul.f32 %v117_v7, %v117_v7 }
   0xa   :  { %v43_v8 = vsel %vm36_vm0, %v34_v4, 0.0  ;;  %v37_v9 = vsel %vm36_vm0, %v32_v5, 0.0  ;;  %v46_v12 = vsel %vm36_vm0, %v35_v10, 0.0  ;;  %v40_v13 = vsel %vm36_vm0, %v33_v11, 0.0 }
   0xb   :  { %44 = vadd.xlane.f32.xlu1 %v43_v8  ;;  %38 = vadd.xlane.f32.xlu0 %v37_v9 }
   0xd   :  { %v128_v15 = vpop.eup %127 }
   0xe   :  { %v50_v16 = vmul.f32 64.0, %v128_v15  ;;  %vm54_vm1 = vweird.f32 %v128_v15 }
  0x10   :  { %v51_v17 = vsub.f32 1.0, %v50_v16 }
  0x12   :  { %v52_v18 = vmul.f32 %v128_v15, %v51_v17 }
  0x13   :  { %47 = vadd.xlane.f32.xlu1 %v46_v12  ;;  %41 = vadd.xlane.f32.xlu0 %v40_v13 }
  0x14   :  { %v53_v19 = vadd.f32 %v128_v15, %v52_v18 }
  0x16   :  { %v55_v20 = vsel %vm54_vm1, %v128_v15, %v53_v19 }
  0x7e   :  { %v45_v21 = vpop.xlane.xlu1 %44  ;;  %v39_v22 = vpop.xlane.xlu0 %38 }
  0x7f   :  { %v58_v23 = vmul.f32 %v55_v20, %v45_v21  ;;  %v56_v24 = vmul.f32 %v55_v20, %v39_v22 }
  0x81   :  { %v62_v25 = vadd.f32 1e-06, %v58_v23  ;;  %v60_v26 = vadd.f32 1e-06, %v56_v24 }
  0x83   :  { %129 = vrsqrt.f32 %v62_v25  ;;  %vm90_vm5 = vweird.f32 %v62_v25  ;;  %vm70_vm7 = vweird.f32 %v60_v26 }
  0x84   :  { %131 = vrsqrt.f32 %v60_v26 }
  0x86   :  { %v48_v27 = vpop.xlane.xlu1 %47  ;;  %v42_v28 = vpop.xlane.xlu0 %41 }
  0x87   :  { %v59_v29 = vmul.f32 %v55_v20, %v48_v27  ;;  %v57_v30 = vmul.f32 %v55_v20, %v42_v28 }
  0x89   :  { %v130_v31 = vpop.eup %129  ;;  %v63_v32 = vadd.f32 1e-06, %v59_v29  ;;  %v61_v33 = vadd.f32 1e-06, %v57_v30 }
  0x8a   :  { %v132_v34 = vpop.eup %131  ;;  %v85_v35 = vmul.f32 %v130_v31, %v62_v25  ;;  %vm91_vm2 = vweird.f32 %v130_v31 }
  0x8b   :  { %v65_v36 = vmul.f32 %v132_v34, %v60_v26  ;;  %133 = vrsqrt.f32 %v63_v32  ;;  %vm71_vm3 = vweird.f32 %v132_v34  ;;  %vm92_vm6 = vmor %vm90_vm5, %vm91_vm2  ;;  %vm100_vm11 = vweird.f32 %v63_v32 }
  0x8c   :  { %v86_v37 = vmul.f32 %v130_v31, %v85_v35  ;;  %135 = vrsqrt.f32 %v61_v33  ;;  %vm72_vm8 = vmor %vm70_vm7, %vm71_vm3  ;;  %vm80_vm13 = vweird.f32 %v61_v33 }
  0x8d   :  { %v66_v38 = vmul.f32 %v132_v34, %v65_v36 }
  0x8e   :  { %v87_v39 = vmul.f32 0.5, %v86_v37 }
  0x8f   :  { %v67_v40 = vmul.f32 0.5, %v66_v38 }
  0x90   :  { %v88_v41 = vsub.f32 1.5, %v87_v39 }
  0x91   :  { %v134_v42 = vpop.eup %133  ;;  %v68_v43 = vsub.f32 1.5, %v67_v40 }
  0x92   :  { %v136_v44 = vpop.eup %135  ;;  %v89_v45 = vmul.f32 %v130_v31, %v88_v41  ;;  %v95_v46 = vmul.f32 %v134_v42, %v63_v32  ;;  %vm101_vm9 = vweird.f32 %v134_v42 }
  0x93   :  { %v69_v47 = vmul.f32 %v132_v34, %v68_v43  ;;  %v75_v48 = vmul.f32 %v136_v44, %v61_v33  ;;  %vm81_vm10 = vweird.f32 %v136_v44  ;;  %vm102_vm12 = vmor %vm100_vm11, %vm101_vm9 }
  0x94   :  { %v93_v49 = vsel %vm92_vm6, %v130_v31, %v89_v45  ;;  %v96_v50 = vmul.f32 %v134_v42, %v95_v46  ;;  %vm82_vm14 = vmor %vm80_vm13, %vm81_vm10 }
  0x95   :  { %107 = vst.msk [vmem:[%s197_s1 + $0x10] sm:$0xff] %vm104_vm4, %v93_v49  ;;  %v73_v51 = vsel %vm72_vm8, %v132_v34, %v69_v47  ;;  %v76_v52 = vmul.f32 %v136_v44, %v75_v48 }
  0x96   :  { %105 = vst.msk [vmem:[%s197_s1] sm:$0xff] %vm104_vm4, %v73_v51  ;;  %v97_v53 = vmul.f32 0.5, %v96_v50 }
  0x97   :  { %v77_v54 = vmul.f32 0.5, %v76_v52 }
  0x98   :  { %v98_v55 = vsub.f32 1.5, %v97_v53 }
  0x99   :  { %v78_v56 = vsub.f32 1.5, %v77_v54 }
  0x9a   :  { %v99_v57 = vmul.f32 %v134_v42, %v98_v55 }
  0x9b   :  { %v79_v58 = vmul.f32 %v136_v44, %v78_v56 }
  0x9c   :  { %v103_v59 = vsel %vm102_vm12, %v134_v42, %v99_v57 }
  0x9d   :  { %108 = vst.msk [vmem:[%s197_s1 + $0x18] sm:$0xff] %vm104_vm4, %v103_v59  ;;  %v83_v60 = vsel %vm82_vm14, %v136_v44, %v79_v58 }
  0x9e   :  { %106 = vst.msk [vmem:[%s197_s1 + $0x8] sm:$0xff] %vm104_vm4, %v83_v60 }
  0x9f   :  { %113 = vsyncpa [#allocation3], 1 }

</bundles_post_ra>
